<compile_context>
chip_gen: v7x
topology: tpu7x:2x2x1
jax: 0.10.0
libtpu: 0.0.40
codegen_flags: <defaults>
</compile_context>

<pallas_src>
import jax
import jax.numpy as jnp
from jax.experimental import pallas as pl
from jax.experimental.pallas import tpu as pltpu


def _round_up(x, m):
    return (x + m - 1) // m * m


def _ceil_div(a, b):
    return -(-a // b)


def _vmem_capacity_bytes():
    try:
        return int(pltpu.get_tpu_info().vmem_capacity_bytes)
    except Exception:
        return 64 << 20  # conservative default (v7x per-TC VMEM)


def _make_gate_kernel(n_col_blocks, matmul_dtype):
    def kernel(x_ref, wt_ref, b_ref, o_ref):
        # x_ref : (tm, D_pad)  row tile, full contraction axis, native dtype
        # wt_ref: (D_pad, tn)  pre-transposed weight column block
        # b_ref : (1, tn)      bias slice
        # o_ref : (tm, tn)     output tile (input dtype)
        x = x_ref[...]
        lhs = x if matmul_dtype is None else x.astype(matmul_dtype)
        logits = jnp.dot(lhs, wt_ref[...], preferred_element_type=jnp.float32)
        logits = logits + b_ref[...].astype(jnp.float32)
        # sigmoid(z) = 1 / (1 + exp(-z)): exp on the EUP, exact reciprocal.
        gate = pl.reciprocal(1.0 + jnp.exp(-logits), approx=False)
        if n_col_blocks == 1:
            # Whole feature dim is one block: reuse the loaded x (no 2nd vld).
            x_cols = x
        else:
            tn = o_ref.shape[-1]
            col0 = pl.multiple_of(pl.program_id(1) * tn, 128)
            x_cols = x_ref[:, pl.ds(col0, tn)]
        o_ref[...] = (x_cols.astype(jnp.float32) * gate).astype(o_ref.dtype)

    return kernel


def gate_layer(x, w, b, *, tm=None, tn=None, weight_transposed=False,
               matmul_dtype=None, interpret=False):
    """GateLayer forward: x * sigmoid(x @ w.T + b).

    x: (..., D) activations; w: (D, D) nn.Linear weight (or W.T if
    weight_transposed=True); b: (D,) bias.
    """
    orig_shape = x.shape
    D = orig_shape[-1]
    M = 1
    for s in orig_shape[:-1]:
        M *= s
    x2 = x.reshape(M, D)

    x_bytes = x.dtype.itemsize
    w = jnp.asarray(w)
    b = jnp.asarray(b)
    w_bytes = (w.dtype.itemsize if matmul_dtype is None
               else jnp.dtype(matmul_dtype).itemsize)
    b_bytes = b.dtype.itemsize

    # ---- generation-aware VMEM budgets -------------------------------------
    vmem_cap = _vmem_capacity_bytes()            # 128 MiB v5e/v6e, 64 MiB v7x
    vmem_ceiling = int(vmem_cap * 0.80)          # leave compiler headroom
    weight_budget = int(vmem_ceiling * 0.60)     # resident W.T (dbl-buffered)

    # ---- lane-dense feature dim (pad only when D % 128 != 0) ----------------
    D_pad = _round_up(D, 128)

    # ---- output-feature tile: largest divisor of D_pad fitting the budget ---
    if tn is None:
        tn_eff = 128
        t = 128
        while t <= D_pad:
            if D_pad % t == 0 and 2 * D_pad * t * w_bytes <= weight_budget:
                tn_eff = t
            t += 128
    else:
        tn_eff = int(tn)
    assert tn_eff % 128 == 0 and D_pad % tn_eff == 0

    # ---- row tile -----------------------------------------------------------
    tm_req = tm if tm is not None else (512 if vmem_cap >= (96 << 20) else 256)
    tm_eff = max(8, min(_round_up(int(tm_req), 8), _round_up(M, 8)))

    def _vmem_need(tm_, tn_):
        return (2 * tm_ * D_pad * x_bytes        # x row tiles (double-buffered)
                + 2 * D_pad * tn_ * w_bytes      # W.T column blocks
                + 2 * tn_ * b_bytes              # bias slices
                + 2 * tm_ * tn_ * x_bytes)       # output tiles

    # Shrink tm first (keeps W.T residency), then tn, until it fits.
    while _vmem_need(tm_eff, tn_eff) > vmem_ceiling and tm_eff > 8:
        tm_eff = max(8, _round_up(tm_eff // 2, 8))
    while _vmem_need(tm_eff, tn_eff) > vmem_ceiling and tn_eff > 128:
        new_tn = 0
        t = 128
        while t <= tn_eff // 2:
            if D_pad % t == 0:
                new_tn = t
            t += 128
        if new_tn == 0:
            break
        tn_eff = new_tn

    # Keep >= 2 row blocks when possible so megacore can shard the row axis
    # even when the column grid collapses to 1 (fully resident W.T).
    if M >= 16 and tm_eff >= M:
        tm_eff = max(8, _round_up(_ceil_div(M, 2), 8))

    n_row_blocks = _ceil_div(M, tm_eff)
    n_col_blocks = D_pad // tn_eff

    # ---- operands: transpose W once; pad only the feature dim when needed ---
    wt = w if weight_transposed else w.T     # pre-transpose at init to skip this
    b2 = b.reshape(1, D)
    if D_pad != D:
        x_p = jnp.pad(x2, ((0, 0), (0, D_pad - D)))
        wt_p = jnp.pad(wt, ((0, D_pad - D), (0, D_pad - D)))
        b_p = jnp.pad(b2, ((0, 0), (0, D_pad - D)))
    else:
        x_p, wt_p, b_p = x2, wt, b2
    if matmul_dtype is not None:
        wt_p = wt_p.astype(matmul_dtype)

    # ---- explicit VMEM limit + advisory cost estimate -----------------------
    vmem_need = _vmem_need(tm_eff, tn_eff)
    vmem_limit = int(min(vmem_cap, max(vmem_need + (4 << 20), 16 << 20)))

    cost = pl.CostEstimate(
        flops=2 * M * D_pad * D_pad + 4 * M * D_pad,
        transcendentals=M * D_pad,
        bytes_accessed=(2 * M * D_pad * x_bytes
                        + D_pad * D_pad * w_bytes
                        + D_pad * b_bytes),
    )

    out = pl.pallas_call(
        _make_gate_kernel(n_col_blocks, matmul_dtype),
        out_shape=jax.ShapeDtypeStruct((M, D_pad), x.dtype),
        grid_spec=pltpu.PrefetchScalarGridSpec(
            num_scalar_prefetch=0,
            grid=(n_row_blocks, n_col_blocks),
            in_specs=[
                pl.BlockSpec((tm_eff, D_pad), lambda i, j: (i, 0)),   # x rows
                pl.BlockSpec((D_pad, tn_eff), lambda i, j: (0, j)),   # W.T cols
                pl.BlockSpec((1, tn_eff), lambda i, j: (0, j)),       # bias
            ],
            out_specs=pl.BlockSpec((tm_eff, tn_eff), lambda i, j: (i, j)),
        ),
        compiler_params=pltpu.CompilerParams(
            dimension_semantics=("parallel", "parallel"),
            vmem_limit_bytes=vmem_limit,
        ),
        cost_estimate=cost,
        interpret=interpret,
    )(x_p, wt_p, b_p)

    if D_pad != D:
        out = out[:, :D]
    return out.reshape(orig_shape)


def gate_layer_ref(x, w, b):
    logits = jnp.einsum("...d,ed->...e", x, w) + b
    return x * jax.nn.sigmoid(logits)


if __name__ == "__main__":
    key = jax.random.PRNGKey(0)
    kx, kw, kb, kx2 = jax.random.split(key, 4)

    # Small shapes consistent with the module: (batch, seq, dim)
    B, S, D = 2, 8, 32
    bound = 1.0 / (D ** 0.5)   # mimic nn.Linear uniform init
    x = jax.random.normal(kx, (B, S, D), dtype=jnp.float32)
    w = jax.random.uniform(kw, (D, D), minval=-bound, maxval=bound,
                           dtype=jnp.float32)
    b = jax.random.uniform(kb, (D,), minval=-bound, maxval=bound,
                           dtype=jnp.float32)

    out = jax.block_until_ready(gate_layer(x, w, b))
    ref = gate_layer_ref(x, w, b)
    assert out.shape == (B, S, D)
    assert jnp.allclose(out, ref, atol=1e-5, rtol=1e-5), "mismatch vs reference"

    # Ragged row count (B*S not a multiple of the row tile) exercises the
    # masked partial edge row block (no row padding anymore).
    x_odd = jax.random.normal(kx2, (2, 7, D), dtype=jnp.float32)
    out_odd = jax.block_until_ready(gate_layer(x_odd, w, b))
    ref_odd = gate_layer_ref(x_odd, w, b)
    assert jnp.allclose(out_odd, ref_odd, atol=1e-5, rtol=1e-5), \
        "mismatch vs reference (partial edge block)"

    print("KERNEL_OK")
</pallas_src>

<mosaic_0001>
module attributes {stable_mosaic.version = 11 : i64} {
  func.func @kernel(%arg0: i32, %arg1: i32, %arg2: memref<8x128xf32, #tpu.memory_space<vmem>>, %arg3: memref<128x128xf32, #tpu.memory_space<vmem>>, %arg4: memref<1x128xf32, #tpu.memory_space<vmem>>, %arg5: memref<8x128xf32, #tpu.memory_space<vmem>>) attributes {dimension_semantics = [#tpu.dimension_semantics<parallel>, #tpu.dimension_semantics<parallel>], iteration_bounds = array<i64: 2, 1>, scalar_prefetch = 0 : i64, scratch_operands = 0 : i64, tpu.core_type = #tpu.core_type<tc>, window_params = [{transform_indices = @transform_0, window_bounds = array<i64: 8, 128>}, {transform_indices = @transform_1, window_bounds = array<i64: 128, 128>}, {transform_indices = @transform_2, window_bounds = array<i64: 1, 128>}, {transform_indices = @transform_3, window_bounds = array<i64: 8, 128>}]} {
    %c0 = arith.constant 0 : index
    %c0_0 = arith.constant 0 : index
    %0 = vector.load %arg2[%c0, %c0_0] : memref<8x128xf32, #tpu.memory_space<vmem>>, vector<8x128xf32>
    %c0_1 = arith.constant 0 : index
    %c0_2 = arith.constant 0 : index
    %1 = vector.load %arg3[%c0_1, %c0_2] : memref<128x128xf32, #tpu.memory_space<vmem>>, vector<128x128xf32>
    %cst = arith.constant dense<0.000000e+00> : vector<8x128xf32>
    %2 = tpu.matmul %0, %1, %cst {dimension_numbers = #tpu.dot_dimension_numbers<[1], [0], [0], [1], [0, 0, 1, 1], [], []>} : vector<8x128xf32>, vector<128x128xf32>, vector<8x128xf32> -> vector<8x128xf32>
    %c0_3 = arith.constant 0 : index
    %c0_4 = arith.constant 0 : index
    %3 = vector.load %arg4[%c0_3, %c0_4] : memref<1x128xf32, #tpu.memory_space<vmem>>, vector<1x128xf32>
    %4 = vector.broadcast %3 : vector<1x128xf32> to vector<8x128xf32>
    %5 = arith.addf %2, %4 : vector<8x128xf32>
    %cst_5 = arith.constant 0.000000e+00 : f32
    %6 = vector.broadcast %cst_5 : f32 to vector<8x128xf32>
    %7 = arith.subf %6, %5 : vector<8x128xf32>
    %8 = math.exp %7 : vector<8x128xf32>
    %cst_6 = arith.constant 1.000000e+00 : f32
    %9 = vector.broadcast %cst_6 : f32 to vector<8x128xf32>
    %10 = arith.addf %9, %8 : vector<8x128xf32>
    %11 = tpu.reciprocal %10 : vector<8x128xf32> -> vector<8x128xf32>
    %12 = arith.mulf %0, %11 : vector<8x128xf32>
    %c0_7 = arith.constant 0 : index
    %c0_8 = arith.constant 0 : index
    %13 = vector.load %arg5[%c0_7, %c0_8] : memref<8x128xf32, #tpu.memory_space<vmem>>, vector<8x128xf32>
    tpu.vector_store %arg5[%c0_7, %c0_8], %12 {strides = array<i32>} : memref<8x128xf32, #tpu.memory_space<vmem>>, vector<8x128xf32>,
    return
  }
  func.func @transform_0(%arg0: i32, %arg1: i32) -> (i32, i32) {
    %c0_i32 = arith.constant 0 : i32
    %c0_i32_0 = arith.constant 0 : i32
    return %arg0, %c0_i32 : i32, i32
  }
  func.func @transform_1(%arg0: i32, %arg1: i32) -> (i32, i32) {
    %c0_i32 = arith.constant 0 : i32
    %c0_i32_0 = arith.constant 0 : i32
    return %c0_i32, %arg1 : i32, i32
  }
  func.func @transform_2(%arg0: i32, %arg1: i32) -> (i32, i32) {
    %c0_i32 = arith.constant 0 : i32
    %c0_i32_0 = arith.constant 0 : i32
    return %c0_i32, %arg1 : i32, i32
  }
  func.func @transform_3(%arg0: i32, %arg1: i32) -> (i32, i32) {
    %c0_i32 = arith.constant 0 : i32
    return %arg0, %arg1 : i32, i32
  }
}

</mosaic_0001>

<bundles_post_ra>
// kernel: tpu_custom_call.1
= control target key start
LH: loop header
LB: loop body
LE: loop exit
PB: predicated region body
PF: predicated region fallthrough
CT: control target
= control target key end

     0   :  { %8 = vsyncpa [#allocation3], 0  ;;  %s1028_s0 = inlined_call_operand.hbm [shape: f32[16,128], index: 0, kind: input, shape index: {}]   ;;  %s1029_s1 = inlined_call_operand.hbm [shape: f32[128,128], index: 1, kind: input, shape index: {}]   ;;  %s1030_s2 = inlined_call_operand.vmem [shape: f32[1,128], index: 2, kind: input, shape index: {}]   ;;  %s1031_s3 = inlined_call_operand.hbm [shape: f32[16,128], index: 3, kind: output, shape index: {}]  }
   0x1   :  { %10 = vsyncpa [#allocation3 + $0x1], 0 }
   0x2   :  { %11 = vsyncpa [#allocation6], 0 }
   0x3   :  { %12 = vsyncpa [#allocation4], 0 }
   0x4   :  { %14 = vsyncpa [#allocation4 + $0x1], 0  ;;  %s804_s12 = smov 0   ;;  %s806_s13 = smov 0  }
   0x5   :  { %s808_s14 = smov 0   ;;  %s810_s15 = smov 0  }
   0x6   :  { %s812_s16 = smov 0   ;;  %s814_s17 = smov 0  }
   0x7 LB: > { %s455_s18 = sadd.s32 4294967295, %s774_s17   ;;  %s456_s19 = sadd.s32 4294967294, %s774_s17   ;;  %s774_s17 = sphi %s814_s17, %s20_s17   ;;  %s770_s16 = sphi %s812_s16, %s1055_s16   ;;  %s766_s15 = sphi %s810_s15, %s1054_s15   ;;  %s762_s14 = sphi %s808_s14, %s1053_s14   ;;  %s758_s13 = sphi %s806_s13, %s1052_s13   ;;  %s754_s12 = sphi %s804_s12, %s1051_s12  }
   0x8   : > { %p52_p0 = scmp.ne.s32.totalorder %s758_s13, %s754_s12  ;;  %p838_p1 = scmp.eq.s32.totalorder %s455_s18, 0 }
   0x9   : > { %p842_p2 = scmp.eq.s32.totalorder %s455_s18, 1  ;;  %p136_p3 = scmp.eq.s32.totalorder %s456_s19, 1 }
   0xa   : > { %s1036_s20 = scalar_select %p838_p1, 1, 0 }
   0xb   : > { %s1037_s21 = scalar_select %p842_p2, 1, 0 }
   0xc   : > { %p848_p4 = por %p838_p1, %p52_p0  ;;  %p457_p5 = scmp.ge.s32.totalorder %s774_s17, 1 }
   0xd   : > { %p853_p6 = por %p136_p3, %p52_p0  ;;  %p143_p7 = scmp.lt.s32.totalorder %s774_s17, 3 }
   0xe   : > { %s1038_s22 = scalar_select %p848_p4, 1, 0 }
   0xf   : > { %s1039_s23 = scalar_select %p853_p6, 1, 0 }
  0x10   : > { %p858_p8 = pnand %p457_p5, %p143_p7  ;;  %s776_s25 = smov [#allocation5]  }
  0x11   : > { %s157_s26 = sshll.u32 %s776_s25, 4  ;;  %s32_s28 = sadd.s32 1, %s770_s16  ;;  %s158_s26 = int_to_ptr.vmem [resolvable:$true] %s157_s26 }
  0x12   : > { %s1040_s24 = scalar_select %p858_p8, 1, 0 }
  0x13   : > { %p556_p9 = pneg %p858_p8  ;;  %s630_s4 = scalar_lea.hbm %s1029_s1, 2048 }
  0x14   : > { %p631_p12 = scmp.ne.s32.totalorder %s1029_s1, %s630_s4  ;;  %p637_p5 = scmp.lt.u32.totalorder %s630_s4, %s1029_s1 }
  0x15   : > { %p867_p11 = pnand %p556_p9, %p838_p1 }
  0x17   : > { %p632_p13 = pneg %p867_p11 }
  0x19   : > { %p633_p0 = pnand %p632_p13, %p631_p12 }
  0x1b   : > { %p634_p3 = pneg %p633_p0 }
  0x1d   : > { %p639_p7 = pnand %p637_p5, %p634_p3 }
  0x1f   : > { %642 = shalt.err (!%p639_p7)
}
  0x20   : > { %s643_s9 = scalar_lea.vmem %s158_s26, 2048  ;;  %p651_p1 = scmp.lt.s32.totalorder %s158_s26, %s158_s26 }
  0x21   : > { %p644_p9 = scmp.ne.s32.totalorder %s158_s26, %s643_s9  ;;  %p652_p4 = scmp.lt.s32.totalorder %s643_s9, %s643_s9 }
  0x23   : > { %p646_p10 = pnand %p644_p9, %p632_p13  ;;  %p653_p8 = por %p652_p4, %p651_p1 }
  0x25   : > { %p647_p6 = pneg %p646_p10 }
  0x27   : > { %p654_p2 = pnand %p653_p8, %p647_p6 }
  0x29   : > { %657 = shalt.err (!%p654_p2)
}
  0x2a   : > { %s777_s10 = smov 128   ;;  %s778_s11 = smov 8  }
  0x2b   : > { %559 = dma.hbm_to_vmem [thread:$0]  (!%p867_p11), %s1029_s1, 2048, %s158_s26, [#allocation6], %s777_s10, %s777_s10, %s778_s11  }
  0x2c   : > { %p34_p1 = scmp.ge.s32.totalorder %s32_s28, 2  ;;  %s39_s25 = sadd.s32 1, %s762_s14 }
  0x2d   : > { %p46_p2 = scmp.ne.s32.totalorder %s762_s14, %s758_s13  ;;  %p47_p4 = scmp.eq.s32.totalorder %s774_s17, 0 }
  0x2e   : > { %s1057_s28 = smov (%p34_p1, %s32_s28), 0  ;;  %p1043_p8 = scmp.ne.s32.totalorder %s1037_s21, 0 }
  0x2f   : > { %p894_p6 = por %p47_p4, %p46_p2  ;;  %s36_s27 = ssub.s32 %s770_s16, %s1057_s28 }
  0x30   : > { %p900_p10 = por %p1043_p8, %p46_p2  ;;  %p569_p12 = scmp.lt.s32.totalorder %s774_s17, 2 }
  0x31   : > { %p37_p11 = scmp.eq.s32.totalorder %s36_s27, 0  ;;  %s177_s26 = sand.u32 1, %s762_s14  }
  0x32   : > { %s461_s4 = sshll.u32 %s177_s26, 3  ;;  %s462_s6 = sshll.u32 %s770_s16, 7 }
  0x33   : > { %s909_s5 = scalar_select %p37_p11, %s762_s14, %s39_s25  }
  0x34   : > { %s915_s9 = scalar_lea.hbm %s1028_s0, %s462_s6  ;;  %s181_s21 = scalar_lea.vmem [#allocation2], %s461_s4 }
  0x35   : > { %s188_s10 = sshll.u32 %s181_s21, 4  ;;  %p921_p13 = pnand %p569_p12, %p894_p6  ;;  %s917_s10 = int_to_ptr.vmem [resolvable:$true] %s188_s10 }
  0x36   : > { %s178_s18 = scalar_lea.sflag [#allocation3], %s177_s26  ;;  %s658_s19 = scalar_lea.hbm %s915_s9, 128 }
  0x37   : > { %p659_p0 = scmp.ne.s32.totalorder %s915_s9, %s658_s19  ;;  %p660_p3 = pneg %p921_p13 }
  0x38   : > { %s663_s4 = scalar_lea.hbm %s1028_s0, 256  ;;  %p664_p9 = scmp.lt.u32.totalorder %s915_s9, %s1028_s0 }
  0x39   : > { %p661_p5 = pnand %p660_p3, %p659_p0  ;;  %p665_p1 = scmp.lt.u32.totalorder %s663_s4, %s658_s19 }
  0x3a   : > { %p667_p4 = scmp.lt.u32.totalorder %s658_s19, %s915_s9 }
  0x3b   : > { %p662_p7 = pneg %p661_p5  ;;  %p666_p2 = por %p665_p1, %p664_p9 }
  0x3d   : > { %p668_p6 = por %p667_p4, %p666_p2 }
  0x3f   : > { %p669_p8 = pnand %p668_p6, %p662_p7 }
  0x41   : > { %672 = shalt.err (!%p669_p8)
}
  0x42   : > { %s673_s26 = scalar_lea.vmem %s917_s10, 128  ;;  %s779_s7 = smov [#allocation2]  }
  0x43   : > { %p674_p12 = scmp.ne.s32.totalorder %s917_s10, %s673_s26  ;;  %s678_s8 = sshll.u32 %s779_s7, 4  ;;  %s679_s8 = int_to_ptr.vmem [resolvable:$false] %s678_s8 }
  0x44   : > { %s680_s21 = scalar_lea.vmem %s679_s8, 256  ;;  %p681_p5 = scmp.lt.s32.totalorder %s917_s10, %s679_s8 }
  0x45   : > { %p676_p11 = pnand %p674_p12, %p660_p3  ;;  %p682_p9 = scmp.lt.s32.totalorder %s680_s21, %s673_s26 }
  0x47   : > { %p677_p0 = pneg %p676_p11  ;;  %p683_p1 = por %p682_p9, %p681_p5 }
  0x49   : > { %p684_p2 = pnand %p683_p1, %p677_p0 }
  0x4b   : > { %687 = shalt.err (!%p684_p2)
}
  0x4c   : > { %563 = dma.hbm_to_vmem [thread:$0]  (!%p921_p13), %s915_s9, 128, %s917_s10, %s178_s18  }
  0x4d   : > { %p1046_p7 = scmp.ne.s32.totalorder %s1040_s24, 0 }
  0x4e   : > { %s953_s19 = sand.u32 (!%p1046_p7), 1, %s758_s13   ;;  %p1047_p3 = scmp.ne.s32.totalorder (!%p1046_p7), %s1038_s22, 0 }
  0x4f   : > { %197 = sbr.rel (%p1046_p7) target bundleno = 383 (0x17f), region = 32  ;;  %s464_s25 = sshll.u32 (!%p1046_p7), %s953_s19, 3 }
  0x50   : > { %s200_s27 = scalar_lea.sflag (!%p1046_p7), [#allocation3], %s953_s19  ;;  %s959_s4 = scalar_lea.vmem (!%p1046_p7), [#allocation2], %s464_s25 }
  0x56   : > { %741 = dma.done.wait (%p1047_p3), %s200_s27, 128  }
  0x57   : > { %743 = vsyncadd (%p1047_p3), %s200_s27, 4294967168  ;;  %p1048_p13 = scmp.ne.s32.totalorder %s1036_s20, 0 }
  0x59   : > { %745 = dma.done.wait (%p1048_p13), [#allocation6], 2048  }
  0x5a   : > { %747 = vsyncadd (%p1048_p13), [#allocation6], 4294965248  ;;  %v780_v0 = vmov 0.0|0.0   ;;  %vm781_vm0 = vmmov 0   ;;  %v782_v1 = vmov 0.0   ;;  %v237_v2 = vld [vmem:[#allocation5] sm:$0xff] }
  0x5b   : > { %524 = vmatprep.subr.bf16.mxu0 %v780_v0  ;;  %521 = vmatprep.mubr.msk.f32.mxu0 %vm781_vm0, %v782_v1  ;;  %v238_v3 = vld [vmem:[#allocation5 + $0x8] sm:$0xff]  ;;  %v239_v4 = vld [vmem:[#allocation5 + $0x10] sm:$0xff]  ;;  %v240_v6 = vld [vmem:[#allocation5 + $0x18] sm:$0xff]  ;;  %s469_s24 = sshll.u32 %s766_s15, 7  ;;  %s232_s9 = scalar_lea.vmem [#allocation7], %s464_s25 }
  0x5c   : > { %v525_v5 = vpack.c.bf16 %v238_v3, %v237_v2  ;;  %v528_v7 = vpack.c.bf16 %v240_v6, %v239_v4  ;;  %v241_v8 = vld [vmem:[#allocation5 + $0x20] sm:$0xff]  ;;  %v242_v9 = vld [vmem:[#allocation5 + $0x28] sm:$0xff]  ;;  %v243_v11 = vld [vmem:[#allocation5 + $0x30] sm:$0xff]  ;;  %s352_s10 = sshll.u32 %s232_s9, 4  ;;  %s979_s29 = scalar_lea.hbm %s1031_s3, %s469_s24  ;;  %s981_s10 = int_to_ptr.vmem [resolvable:$true] %s352_s10 }
  0x5d   : > { %v531_v10 = vpack.c.bf16 %v242_v9, %v241_v8  ;;  %v244_v12 = vld [vmem:[#allocation5 + $0x38] sm:$0xff]  ;;  %v245_v14 = vld [vmem:[#allocation5 + $0x40] sm:$0xff]  ;;  %v246_v15 = vld [vmem:[#allocation5 + $0x48] sm:$0xff]  ;;  %s338_s6 = scalar_lea.sflag [#allocation4], %s953_s19  ;;  %s688_s26 = scalar_lea.vmem %s981_s10, 128 }
  0x5e   : > { %526 = vmatpush3.bf16.msra.mxu0 %v525_v5  ;;  %v534_v13 = vpack.c.bf16 %v244_v12, %v243_v11  ;;  %v537_v16 = vpack.c.bf16 %v246_v15, %v245_v14  ;;  %v247_v17 = vld [vmem:[#allocation5 + $0x50] sm:$0xff]  ;;  %v248_v18 = vld [vmem:[#allocation5 + $0x58] sm:$0xff]  ;;  %v249_v20 = vld [vmem:[#allocation5 + $0x60] sm:$0xff]  ;;  %p689_p4 = scmp.ne.s32.totalorder %s981_s10, %s688_s26  ;;  %s783_s15 = smov [#allocation7]  }
  0x5f   : > { %527 = vmatprep.subr.bf16.mxu0 %v780_v0  ;;  %v540_v19 = vpack.c.bf16 %v248_v18, %v247_v17  ;;  %v250_v21 = vld [vmem:[#allocation5 + $0x68] sm:$0xff]  ;;  %v251_v23 = vld [vmem:[#allocation5 + $0x70] sm:$0xff]  ;;  %v252_v24 = vld [vmem:[#allocation5 + $0x78] sm:$0xff]  ;;  %s692_s7 = sshll.u32 %s783_s15, 4  ;;  %s693_s7 = int_to_ptr.vmem [resolvable:$false] %s692_s7 }
  0x60   : > { %v543_v22 = vpack.c.bf16 %v250_v21, %v249_v20  ;;  %v546_v25 = vpack.c.bf16 %v252_v24, %v251_v23  ;;  %v236_v26 = vld [vmem:[%s959_s4] sm:$0xff]  ;;  %p690_p6 = pnand %p689_p4, %p900_p10  ;;  %s694_s8 = scalar_lea.vmem %s693_s7, 256 }
  0x61   : > { %v467_v27 = vld [vmem:[%s1030_s2] ss:$0 sm:$0xff]  ;;  %p695_p12 = scmp.lt.s32.totalorder %s981_s10, %s693_s7  ;;  %p696_p11 = scmp.lt.s32.totalorder %s694_s8, %s688_s26 }
  0x62   : > { %529 = vmatpush3.bf16.msra.mxu0 %v528_v7  ;;  %p691_p8 = pneg %p690_p6 }
  0x63   : > { %530 = vmatprep.subr.bf16.mxu0 %v780_v0  ;;  %p697_p0 = por %p696_p11, %p695_p12 }
  0x65   : > { %p698_p5 = pnand %p697_p0, %p691_p8 }
  0x66   : > { %532 = vmatpush3.bf16.msra.mxu0 %v531_v10 }
  0x67   : > { %533 = vmatprep.subr.bf16.mxu0 %v780_v0 }
  0x6a   : > { %535 = vmatpush3.bf16.msra.mxu0 %v534_v13 }
  0x6b   : > { %536 = vmatprep.subr.bf16.mxu0 %v780_v0 }
  0x6e   : > { %538 = vmatpush3.bf16.msra.mxu0 %v537_v16 }
  0x6f   : > { %539 = vmatprep.subr.bf16.mxu0 %v780_v0 }
  0x72   : > { %541 = vmatpush3.bf16.msra.mxu0 %v540_v19 }
  0x73   : > { %542 = vmatprep.subr.bf16.mxu0 %v780_v0 }
  0x76   : > { %544 = vmatpush3.bf16.msra.mxu0 %v543_v22 }
  0x77   : > { %545 = vmatprep.subr.bf16.mxu0 %v780_v0 }
  0x7a   : > { %547 = vmatpush3.bf16.msra.mxu0 %v546_v25 }
  0x7d   : > { %522 = vmatmul.mubr.f32.vlgmr.msra.gmra.mrb[0].mxu0 %v236_v26 }
 0x150   : > { %v326_v28 = vpop.f32.mrb[0].mxu0 }
 0x151   : > { %v327_v29 = vadd.f32 %v467_v27, %v326_v28  ;;  %v523_v30 = vpop.f32.mrb[1].mxu0 }
 0x153   : > { %v330_v31 = vsub.f32 0.0, %v327_v29 }
 0x155   : > { %v331_v32 = vmul.f32 1.442695, %v330_v31 }
 0x157   : > { %626 = vpow2.f32 %v331_v32 }
 0x161   : > { %v627_v33 = vpop.eup %626 }
 0x162   : > { %v333_v34 = vadd.f32 1.0, %v627_v33 }
 0x164   : > { %628 = vrcp.f32 %v333_v34 }
 0x16e   : > { %v629_v35 = vpop.eup %628 }
 0x16f   : > { %v335_v36 = vmul.f32 %v629_v35, %v236_v26 }
 0x171   : > { %336 = vst [vmem:[%s232_s9] sm:$0xff] %v335_v36 }
 0x172   : > { %701 = shalt.err (!%p698_p5)
}
 0x173   : > { %s702_s21 = scalar_lea.hbm %s979_s29, 128  ;;  %s706_s27 = scalar_lea.hbm %s1031_s3, 256 }
 0x174   : > { %p703_p9 = scmp.ne.s32.totalorder %s979_s29, %s702_s21  ;;  %p707_p7 = scmp.lt.u32.totalorder %s979_s29, %s1031_s3 }
 0x175   : > { %p708_p3 = scmp.lt.u32.totalorder %s706_s27, %s702_s21  ;;  %p710_p4 = scmp.lt.u32.totalorder %s702_s21, %s979_s29 }
 0x176   : > { %p704_p1 = pnand %p703_p9, %p900_p10 }
 0x177   : > { %p709_p13 = por %p708_p3, %p707_p7 }
 0x178   : > { %p705_p2 = pneg %p704_p1 }
 0x179   : > { %p711_p6 = por %p710_p4, %p709_p13 }
 0x17b   : > { %p712_p8 = pnand %p711_p6, %p705_p2 }
 0x17d   : > { %715 = shalt.err (!%p712_p8)
}
 0x17e   : > { %554 = dma.vmem_to_hbm [thread:$0]  (%p900_p10), %s981_s10, 128, %s979_s29, %s338_s6  }
 0x17f PF: > { %s364_s22 = sand.u32 1, %s754_s12   ;;  %p1049_p12 = scmp.ne.s32.totalorder %s1039_s23, 0 }
 0x180   : > { %p1050_p11 = scmp.ge.s32.totalorder %s774_s17, 2  ;;  %s365_s24 = scalar_lea.sflag [#allocation4], %s364_s22 }
 0x182   : > { %p565_p0 = pnand %p1050_p11, %p1049_p12 }
 0x184   : > { %749 = dma.done.wait (!%p565_p0), %s365_s24, 128  }
 0x185   : > { %751 = vsyncadd (!%p565_p0), %s365_s24, 4294967168  ;;  %s20_s17 = sadd.s32 1, %s774_s17   ;;  %s1051_s12 = smov %s758_s13 }
 0x186   : > { %p17_p5 = scmp.ge.s32.totalorder %s20_s17, 4   ;;  %s1052_s13 = smov %s762_s14 }
 0x187   : > { %s1053_s14 = smov %s909_s5  ;;  %s1054_s15 = smov %s770_s16 }
 0x188   : > { %s1055_s16 = smov %s1057_s28  ;;  %19 = sbr.rel (!%p17_p5) target bundleno = 7 (0x7), region = 85 }
 0x18f   :  { %370 = vsyncpa [#allocation3], 1 }
 0x190   :  { %372 = vsyncpa [#allocation3 + $0x1], 1 }
 0x191   :  { %373 = vsyncpa [#allocation6], 1 }
 0x192   :  { %374 = vsyncpa [#allocation4], 1 }
 0x193   :  { %376 = vsyncpa [#allocation4 + $0x1], 1 }

</bundles_post_ra>
